<compile_context>
chip_gen: v5e
topology: v5e:2x2
jax: 0.10.0
libtpu: 0.0.40
codegen_flags: <defaults>
</compile_context>

<pallas_src>
import functools

import jax
import jax.numpy as jnp
from jax import lax
from jax.experimental import pallas as pl
from jax.experimental.pallas import tpu as pltpu


LEAKY_SLOPE = 0.2
EPS = 1e-5


def _conv1d_block_kernel(x_ref, w1_ref, w2_ref, w3_ref, ws_ref, b_ref, o_ref):
    """One grid step == `B` batch samples, channels-first (C, L) layout.

    x_ref  : (B, Cin, L+4)    bf16 input, zero-padded by 2 on each side of L
    w1_ref : (3, Cout, Cin)   first k=3 conv, one (Cout, Cin) slab per tap (bf16)
    w2_ref : (3, Cout, Cout)  second k=3 conv (bf16)
    w3_ref : (Cout, Cout)     final 1x1 conv (bf16)
    ws_ref : (Cout, Cin)      1x1 shortcut conv (bf16)
    b_ref  : (Cout, 1)        b3 + bs (f32)
    o_ref  : (B, Cout, L)     f32 output
    """
    n_b, c_out, seq = o_ref.shape
    seq_p2 = seq + 2                     # conv1 is evaluated on L+2 positions
    inv_seq = 1.0 / seq

    # Weights / bias / masks hoisted out of the per-sample loop.
    w1 = (w1_ref[0], w1_ref[1], w1_ref[2])
    w2 = (w2_ref[0], w2_ref[1], w2_ref[2])
    w3 = w3_ref[...]
    ws = ws_ref[...]
    bias = b_ref[...]

    # Columns 1..L of the (Cout, L+2) conv1 slab are real; 0 and L+1 are halo.
    col = lax.broadcasted_iota(jnp.int32, (c_out, seq_p2), 1)
    valid = (col >= 1) & (col <= seq)

    def leaky_relu(h):
        return jnp.where(h >= 0, h, LEAKY_SLOPE * h)

    def conv3_taps(src, taps, width):
        """k=3 conv as three accumulated MXU dots over lane-shifted views."""
        acc = jnp.dot(taps[0], src[:, 0:width],
                      preferred_element_type=jnp.float32)
        acc = acc + jnp.dot(taps[1], src[:, 1:width + 1],
                            preferred_element_type=jnp.float32)
        acc = acc + jnp.dot(taps[2], src[:, 2:width + 2],
                            preferred_element_type=jnp.float32)
        return acc

    for b in range(n_b):                 # static unrolled; iterations independent
        xp = x_ref[b]                                    # (Cin, L+4) bf16
        x_mid = xp[:, 2:seq + 2]                         # un-padded input (shortcut)

        # --- conv1 (k=3, pad=1, no bias) evaluated on L+2 positions so its
        #     IN/LeakyReLU output directly carries the zero halo conv2 needs ---
        h1 = conv3_taps(xp, w1, seq_p2)                  # (Cout, L+2) f32
        h1 = jnp.where(valid, h1, 0.0)                   # zero the 2 halo columns
        mu1 = jnp.sum(h1, axis=-1, keepdims=True) * inv_seq
        c1 = jnp.where(valid, h1 - mu1, 0.0)             # centered, halo stays 0
        var1 = jnp.sum(c1 * c1, axis=-1, keepdims=True) * inv_seq
        a1 = leaky_relu(c1 * lax.rsqrt(var1 + EPS))      # halo columns remain 0

        # --- conv2 (k=3, pad=1, no bias) -> IN -> LeakyReLU ---
        h2 = conv3_taps(a1.astype(jnp.bfloat16), w2, seq)    # (Cout, L) f32
        mu2 = jnp.mean(h2, axis=-1, keepdims=True)
        c2 = h2 - mu2
        var2 = jnp.mean(c2 * c2, axis=-1, keepdims=True)
        a2 = leaky_relu(c2 * lax.rsqrt(var2 + EPS))

        # --- conv3 (1x1, bias) + shortcut (1x1, bias): two dots, one bias ---
        out = (jnp.dot(w3, a2.astype(jnp.bfloat16),
                       preferred_element_type=jnp.float32)
               + jnp.dot(ws, x_mid, preferred_element_type=jnp.float32)
               + bias)
        o_ref[b] = out.astype(o_ref.dtype)


@functools.lru_cache(maxsize=1)
def _vmem_limit_bytes() -> int:
    """Generation-aware scoped-VMEM limit (v7x: 64 MiB phys, v5e/v6e: 128 MiB)."""
    try:
        cap = int(pltpu.get_tpu_info().vmem_capacity_bytes)
    except Exception:  # fall back to a v7x-safe value
        cap = 64 * 1024 * 1024
    return max(32 * 1024 * 1024, min((cap * 3) // 4, 100 * 1024 * 1024))


def _pick_samples_per_step(n, c_in, c_out, seq, vmem_limit):
    """Largest divisor of `n` (capped at 8) whose working set fits the budget."""
    per_sample = (2 * 2 * c_in * (seq + 4)        # bf16 input block, double-buffered
                  + 2 * 4 * c_out * seq           # f32 output block, double-buffered
                  + 10 * 4 * c_out * (seq + 2))   # live f32/bf16 intermediates
    budget = max(vmem_limit // 2, 1)
    best = 1
    for cand in range(1, min(n, 8) + 1):
        if n % cand == 0 and cand * per_sample <= budget:
            best = cand
    return best


@jax.jit
def conv1d_block_pallas(x_ncl, w1, w2, w3, b3, ws, bs):
    """x_ncl: (N, Cin, L) float32 (PyTorch NCL).  Returns (N, Cout, L) float32."""
    n, c_in, seq = x_ncl.shape
    c_out = w1.shape[0]

    vmem_limit = _vmem_limit_bytes()
    bsz = _pick_samples_per_step(n, c_in, c_out, seq, vmem_limit)

    # Zero-pad L by 2 each side and stream the activation in bf16 (it is only
    # ever consumed as a bf16 MXU operand); pad + cast fuse into one XLA op.
    x_pad = jnp.pad(x_ncl, ((0, 0), (0, 0), (2, 2))).astype(jnp.bfloat16)

    # Weight prep: one (Cout, C) slab per conv tap, bf16 MXU operands, fused bias.
    w1_k = jnp.transpose(w1, (2, 0, 1)).astype(jnp.bfloat16)     # (3, Cout, Cin)
    w2_k = jnp.transpose(w2, (2, 0, 1)).astype(jnp.bfloat16)     # (3, Cout, Cout)
    w3_k = w3[:, :, 0].astype(jnp.bfloat16)                      # (Cout, Cout)
    ws_k = ws[:, :, 0].astype(jnp.bfloat16)                      # (Cout, Cin)
    b_k = (b3 + bs).reshape(c_out, 1).astype(jnp.float32)

    return pl.pallas_call(
        _conv1d_block_kernel,
        out_shape=jax.ShapeDtypeStruct((n, c_out, seq), jnp.float32),
        grid=(n // bsz,),
        in_specs=[
            pl.BlockSpec((bsz, c_in, seq + 4), lambda i: (i, 0, 0)),   # x (padded, bf16)
            pl.BlockSpec((3, c_out, c_in), lambda i: (0, 0, 0)),       # conv1 taps
            pl.BlockSpec((3, c_out, c_out), lambda i: (0, 0, 0)),      # conv2 taps
            pl.BlockSpec((c_out, c_out), lambda i: (0, 0)),            # conv3 1x1
            pl.BlockSpec((c_out, c_in), lambda i: (0, 0)),             # shortcut 1x1
            pl.BlockSpec((c_out, 1), lambda i: (0, 0)),                # b3 + bs
        ],
        out_specs=pl.BlockSpec((bsz, c_out, seq), lambda i: (i, 0, 0)),
        compiler_params=pltpu.CompilerParams(
            dimension_semantics=("parallel",),
            vmem_limit_bytes=vmem_limit),
    )(x_pad, w1_k, w2_k, w3_k, ws_k, b_k)


# ---------------- pure-JAX reference (for correctness check) ----------------
def _conv1d_ref(x_ncl, w_oik, padding):
    return lax.conv_general_dilated(
        x_ncl, w_oik, window_strides=(1,), padding=[(padding, padding)],
        dimension_numbers=("NCH", "OIH", "NCH"))


def _instance_norm_ref(h):
    mu = jnp.mean(h, axis=-1, keepdims=True)
    var = jnp.mean((h - mu) ** 2, axis=-1, keepdims=True)
    return (h - mu) / jnp.sqrt(var + EPS)


def _leaky_ref(h):
    return jnp.where(h >= 0, h, LEAKY_SLOPE * h)


def conv1d_block_ref(x, w1, w2, w3, b3, ws, bs):
    h = _leaky_ref(_instance_norm_ref(_conv1d_ref(x, w1, 1)))
    h = _leaky_ref(_instance_norm_ref(_conv1d_ref(h, w2, 1)))
    h = _conv1d_ref(h, w3, 0) + b3[None, :, None]
    sc = _conv1d_ref(x, ws, 0) + bs[None, :, None]
    return h + sc


if __name__ == "__main__":
    # Small, module-consistent shapes: batch=2, in_channels=4, out_channels=8, L=16.
    N, Cin, Cout, L = 2, 4, 8, 16

    key = jax.random.PRNGKey(0)
    kx, k1, k2, k3, kb3, ks, kbs = jax.random.split(key, 7)

    x = jax.random.normal(kx, (N, Cin, L), jnp.float32)
    w1 = 0.2 * jax.random.normal(k1, (Cout, Cin, 3), jnp.float32)
    w2 = 0.2 * jax.random.normal(k2, (Cout, Cout, 3), jnp.float32)
    w3 = 0.2 * jax.random.normal(k3, (Cout, Cout, 1), jnp.float32)
    b3 = 0.1 * jax.random.normal(kb3, (Cout,), jnp.float32)
    ws = 0.2 * jax.random.normal(ks, (Cout, Cin, 1), jnp.float32)
    bs = 0.1 * jax.random.normal(kbs, (Cout,), jnp.float32)

    out = conv1d_block_pallas(x, w1, w2, w3, b3, ws, bs)
    out = jax.block_until_ready(out)

    ref = conv1d_block_ref(x, w1, w2, w3, b3, ws, bs)
    assert out.shape == (N, Cout, L), out.shape
    # bf16 MXU inputs with f32 accumulation -> loosened tolerance vs fp32 ref.
    max_err = float(jnp.max(jnp.abs(out - ref)))
    assert jnp.allclose(out, ref, rtol=5e-2, atol=5e-2), max_err

    print("KERNEL_OK")
</pallas_src>

<mosaic_0001>
module attributes {stable_mosaic.version = 11 : i64} {
  func.func @_conv1d_block_kernel(%arg0: i32, %arg1: memref<2x4x20xbf16, #tpu.memory_space<vmem>>, %arg2: memref<3x8x4xbf16, #tpu.memory_space<vmem>>, %arg3: memref<3x8x8xbf16, #tpu.memory_space<vmem>>, %arg4: memref<8x8xbf16, #tpu.memory_space<vmem>>, %arg5: memref<8x4xbf16, #tpu.memory_space<vmem>>, %arg6: memref<8x1xf32, #tpu.memory_space<vmem>>, %arg7: memref<2x8x16xf32, #tpu.memory_space<vmem>>) attributes {dimension_semantics = [#tpu.dimension_semantics<parallel>], iteration_bounds = array<i64: 1>, scalar_prefetch = 0 : i64, scratch_operands = 0 : i64, tpu.core_type = #tpu.core_type<tc>, window_params = [{transform_indices = @transform_0, window_bounds = array<i64: 2, 4, 20>}, {pipeline_mode = #tpu.pipeline_mode<synchronous>, transform_indices = @transform_1, window_bounds = array<i64: 3, 8, 4>}, {pipeline_mode = #tpu.pipeline_mode<synchronous>, transform_indices = @transform_2, window_bounds = array<i64: 3, 8, 8>}, {pipeline_mode = #tpu.pipeline_mode<synchronous>, transform_indices = @transform_3, window_bounds = array<i64: 8, 8>}, {pipeline_mode = #tpu.pipeline_mode<synchronous>, transform_indices = @transform_4, window_bounds = array<i64: 8, 4>}, {pipeline_mode = #tpu.pipeline_mode<synchronous>, transform_indices = @transform_5, window_bounds = array<i64: 8, 1>}, {transform_indices = @transform_6, window_bounds = array<i64: 2, 8, 16>}]} {
    %c0 = arith.constant 0 : index
    %c0_0 = arith.constant 0 : index
    %c0_1 = arith.constant 0 : index
    %0 = vector.load %arg2[%c0, %c0_0, %c0_1] : memref<3x8x4xbf16, #tpu.memory_space<vmem>>, vector<1x8x4xbf16>
    %1 = vector.shape_cast %0 : vector<1x8x4xbf16> to vector<8x4xbf16>
    %c1 = arith.constant 1 : index
    %c0_2 = arith.constant 0 : index
    %c0_3 = arith.constant 0 : index
    %2 = vector.load %arg2[%c1, %c0_2, %c0_3] : memref<3x8x4xbf16, #tpu.memory_space<vmem>>, vector<1x8x4xbf16>
    %3 = vector.shape_cast %2 : vector<1x8x4xbf16> to vector<8x4xbf16>
    %c2 = arith.constant 2 : index
    %c0_4 = arith.constant 0 : index
    %c0_5 = arith.constant 0 : index
    %4 = vector.load %arg2[%c2, %c0_4, %c0_5] : memref<3x8x4xbf16, #tpu.memory_space<vmem>>, vector<1x8x4xbf16>
    %5 = vector.shape_cast %4 : vector<1x8x4xbf16> to vector<8x4xbf16>
    %c0_6 = arith.constant 0 : index
    %c0_7 = arith.constant 0 : index
    %c0_8 = arith.constant 0 : index
    %6 = vector.load %arg3[%c0_6, %c0_7, %c0_8] : memref<3x8x8xbf16, #tpu.memory_space<vmem>>, vector<1x8x8xbf16>
    %7 = vector.shape_cast %6 : vector<1x8x8xbf16> to vector<8x8xbf16>
    %c1_9 = arith.constant 1 : index
    %c0_10 = arith.constant 0 : index
    %c0_11 = arith.constant 0 : index
    %8 = vector.load %arg3[%c1_9, %c0_10, %c0_11] : memref<3x8x8xbf16, #tpu.memory_space<vmem>>, vector<1x8x8xbf16>
    %9 = vector.shape_cast %8 : vector<1x8x8xbf16> to vector<8x8xbf16>
    %c2_12 = arith.constant 2 : index
    %c0_13 = arith.constant 0 : index
    %c0_14 = arith.constant 0 : index
    %10 = vector.load %arg3[%c2_12, %c0_13, %c0_14] : memref<3x8x8xbf16, #tpu.memory_space<vmem>>, vector<1x8x8xbf16>
    %11 = vector.shape_cast %10 : vector<1x8x8xbf16> to vector<8x8xbf16>
    %c0_15 = arith.constant 0 : index
    %c0_16 = arith.constant 0 : index
    %12 = vector.load %arg4[%c0_15, %c0_16] : memref<8x8xbf16, #tpu.memory_space<vmem>>, vector<8x8xbf16>
    %c0_17 = arith.constant 0 : index
    %c0_18 = arith.constant 0 : index
    %13 = vector.load %arg5[%c0_17, %c0_18] : memref<8x4xbf16, #tpu.memory_space<vmem>>, vector<8x4xbf16>
    %c0_19 = arith.constant 0 : index
    %c0_20 = arith.constant 0 : index
    %14 = vector.load %arg6[%c0_19, %c0_20] : memref<8x1xf32, #tpu.memory_space<vmem>>, vector<8x1xf32>
    %15 = tpu.iota {dimensions = array<i32: 1>} : vector<8x18xi32>
    %c1_i32 = arith.constant 1 : i32
    %16 = vector.broadcast %c1_i32 : i32 to vector<8x18xi32>
    %17 = arith.cmpi sge, %15, %16 : vector<8x18xi32>
    %c16_i32 = arith.constant 16 : i32
    %18 = vector.broadcast %c16_i32 : i32 to vector<8x18xi32>
    %19 = arith.cmpi sle, %15, %18 : vector<8x18xi32>
    %20 = arith.andi %17, %19 : vector<8x18xi1>
    %c0_21 = arith.constant 0 : index
    %c0_22 = arith.constant 0 : index
    %c0_23 = arith.constant 0 : index
    %21 = vector.load %arg1[%c0_21, %c0_22, %c0_23] : memref<2x4x20xbf16, #tpu.memory_space<vmem>>, vector<1x4x20xbf16>
    %22 = vector.shape_cast %21 : vector<1x4x20xbf16> to vector<4x20xbf16>
    %23 = vector.extract_strided_slice %22 {offsets = [0, 2], sizes = [4, 16], strides = [1, 1]} : vector<4x20xbf16> to vector<4x16xbf16>
    %24 = vector.extract_strided_slice %22 {offsets = [0, 0], sizes = [4, 18], strides = [1, 1]} : vector<4x20xbf16> to vector<4x18xbf16>
    %cst = arith.constant dense<0.000000e+00> : vector<8x18xf32>
    %25 = tpu.matmul %1, %24, %cst {dimension_numbers = #tpu.dot_dimension_numbers<[1], [0], [0], [1], [0, 0, 1, 1], [], []>} : vector<8x4xbf16>, vector<4x18xbf16>, vector<8x18xf32> -> vector<8x18xf32>
    %26 = vector.extract_strided_slice %22 {offsets = [0, 1], sizes = [4, 18], strides = [1, 1]} : vector<4x20xbf16> to vector<4x18xbf16>
    %cst_24 = arith.constant dense<0.000000e+00> : vector<8x18xf32>
    %27 = tpu.matmul %3, %26, %cst_24 {dimension_numbers = #tpu.dot_dimension_numbers<[1], [0], [0], [1], [0, 0, 1, 1], [], []>} : vector<8x4xbf16>, vector<4x18xbf16>, vector<8x18xf32> -> vector<8x18xf32>
    %28 = arith.addf %25, %27 : vector<8x18xf32>
    %29 = vector.extract_strided_slice %22 {offsets = [0, 2], sizes = [4, 18], strides = [1, 1]} : vector<4x20xbf16> to vector<4x18xbf16>
    %cst_25 = arith.constant dense<0.000000e+00> : vector<8x18xf32>
    %30 = tpu.matmul %5, %29, %cst_25 {dimension_numbers = #tpu.dot_dimension_numbers<[1], [0], [0], [1], [0, 0, 1, 1], [], []>} : vector<8x4xbf16>, vector<4x18xbf16>, vector<8x18xf32> -> vector<8x18xf32>
    %31 = arith.addf %28, %30 : vector<8x18xf32>
    %cst_26 = arith.constant 0.000000e+00 : f32
    %32 = vector.broadcast %cst_26 : f32 to vector<8x18xf32>
    %33 = arith.select %20, %31, %32 : vector<8x18xi1>, vector<8x18xf32>
    %cst_27 = arith.constant dense<0.000000e+00> : vector<8xf32>
    %34 = vector.multi_reduction <add>, %33, %cst_27 [1] : vector<8x18xf32> to vector<8xf32>
    %35 = vector.shape_cast %34 : vector<8xf32> to vector<8x1xf32>
    %cst_28 = arith.constant 6.250000e-02 : f32
    %36 = vector.broadcast %cst_28 : f32 to vector<8x1xf32>
    %37 = arith.mulf %35, %36 : vector<8x1xf32>
    %38 = vector.broadcast %37 : vector<8x1xf32> to vector<8x18xf32>
    %39 = arith.subf %33, %38 : vector<8x18xf32>
    %cst_29 = arith.constant 0.000000e+00 : f32
    %40 = vector.broadcast %cst_29 : f32 to vector<8x18xf32>
    %41 = arith.select %20, %39, %40 : vector<8x18xi1>, vector<8x18xf32>
    %42 = arith.mulf %41, %41 : vector<8x18xf32>
    %cst_30 = arith.constant dense<0.000000e+00> : vector<8xf32>
    %43 = vector.multi_reduction <add>, %42, %cst_30 [1] : vector<8x18xf32> to vector<8xf32>
    %44 = vector.shape_cast %43 : vector<8xf32> to vector<8x1xf32>
    %cst_31 = arith.constant 6.250000e-02 : f32
    %45 = vector.broadcast %cst_31 : f32 to vector<8x1xf32>
    %46 = arith.mulf %44, %45 : vector<8x1xf32>
    %cst_32 = arith.constant 9.99999974E-6 : f32
    %47 = vector.broadcast %cst_32 : f32 to vector<8x1xf32>
    %48 = arith.addf %46, %47 : vector<8x1xf32>
    %49 = math.rsqrt %48 : vector<8x1xf32>
    %50 = vector.broadcast %49 : vector<8x1xf32> to vector<8x18xf32>
    %51 = arith.mulf %41, %50 : vector<8x18xf32>
    %cst_33 = arith.constant 0.000000e+00 : f32
    %52 = vector.broadcast %cst_33 : f32 to vector<8x18xf32>
    %53 = arith.cmpf oge, %51, %52 : vector<8x18xf32>
    %cst_34 = arith.constant 2.000000e-01 : f32
    %54 = vector.broadcast %cst_34 : f32 to vector<8x18xf32>
    %55 = arith.mulf %54, %51 : vector<8x18xf32>
    %56 = arith.select %53, %51, %55 : vector<8x18xi1>, vector<8x18xf32>
    %57 = arith.truncf %56 : vector<8x18xf32> to vector<8x18xbf16>
    %58 = vector.extract_strided_slice %57 {offsets = [0, 0], sizes = [8, 16], strides = [1, 1]} : vector<8x18xbf16> to vector<8x16xbf16>
    %cst_35 = arith.constant dense<0.000000e+00> : vector<8x16xf32>
    %59 = tpu.matmul %7, %58, %cst_35 {dimension_numbers = #tpu.dot_dimension_numbers<[1], [0], [0], [1], [0, 0, 1, 1], [], []>} : vector<8x8xbf16>, vector<8x16xbf16>, vector<8x16xf32> -> vector<8x16xf32>
    %60 = vector.extract_strided_slice %57 {offsets = [0, 1], sizes = [8, 16], strides = [1, 1]} : vector<8x18xbf16> to vector<8x16xbf16>
    %cst_36 = arith.constant dense<0.000000e+00> : vector<8x16xf32>
    %61 = tpu.matmul %9, %60, %cst_36 {dimension_numbers = #tpu.dot_dimension_numbers<[1], [0], [0], [1], [0, 0, 1, 1], [], []>} : vector<8x8xbf16>, vector<8x16xbf16>, vector<8x16xf32> -> vector<8x16xf32>
    %62 = arith.addf %59, %61 : vector<8x16xf32>
    %63 = vector.extract_strided_slice %57 {offsets = [0, 2], sizes = [8, 16], strides = [1, 1]} : vector<8x18xbf16> to vector<8x16xbf16>
    %cst_37 = arith.constant dense<0.000000e+00> : vector<8x16xf32>
    %64 = tpu.matmul %11, %63, %cst_37 {dimension_numbers = #tpu.dot_dimension_numbers<[1], [0], [0], [1], [0, 0, 1, 1], [], []>} : vector<8x8xbf16>, vector<8x16xbf16>, vector<8x16xf32> -> vector<8x16xf32>
    %65 = arith.addf %62, %64 : vector<8x16xf32>
    %cst_38 = arith.constant dense<0.000000e+00> : vector<8xf32>
    %66 = vector.multi_reduction <add>, %65, %cst_38 [1] : vector<8x16xf32> to vector<8xf32>
    %67 = vector.shape_cast %66 : vector<8xf32> to vector<8x1xf32>
    %cst_39 = arith.constant 1.600000e+01 : f32
    %68 = vector.broadcast %cst_39 : f32 to vector<8x1xf32>
    %69 = arith.divf %67, %68 : vector<8x1xf32>
    %70 = vector.broadcast %69 : vector<8x1xf32> to vector<8x16xf32>
    %71 = arith.subf %65, %70 : vector<8x16xf32>
    %72 = arith.mulf %71, %71 : vector<8x16xf32>
    %cst_40 = arith.constant dense<0.000000e+00> : vector<8xf32>
    %73 = vector.multi_reduction <add>, %72, %cst_40 [1] : vector<8x16xf32> to vector<8xf32>
    %74 = vector.shape_cast %73 : vector<8xf32> to vector<8x1xf32>
    %cst_41 = arith.constant 1.600000e+01 : f32
    %75 = vector.broadcast %cst_41 : f32 to vector<8x1xf32>
    %76 = arith.divf %74, %75 : vector<8x1xf32>
    %cst_42 = arith.constant 9.99999974E-6 : f32
    %77 = vector.broadcast %cst_42 : f32 to vector<8x1xf32>
    %78 = arith.addf %76, %77 : vector<8x1xf32>
    %79 = math.rsqrt %78 : vector<8x1xf32>
    %80 = vector.broadcast %79 : vector<8x1xf32> to vector<8x16xf32>
    %81 = arith.mulf %71, %80 : vector<8x16xf32>
    %cst_43 = arith.constant 0.000000e+00 : f32
    %82 = vector.broadcast %cst_43 : f32 to vector<8x16xf32>
    %83 = arith.cmpf oge, %81, %82 : vector<8x16xf32>
    %cst_44 = arith.constant 2.000000e-01 : f32
    %84 = vector.broadcast %cst_44 : f32 to vector<8x16xf32>
    %85 = arith.mulf %84, %81 : vector<8x16xf32>
    %86 = arith.select %83, %81, %85 : vector<8x16xi1>, vector<8x16xf32>
    %87 = arith.truncf %86 : vector<8x16xf32> to vector<8x16xbf16>
    %cst_45 = arith.constant dense<0.000000e+00> : vector<8x16xf32>
    %88 = tpu.matmul %12, %87, %cst_45 {dimension_numbers = #tpu.dot_dimension_numbers<[1], [0], [0], [1], [0, 0, 1, 1], [], []>} : vector<8x8xbf16>, vector<8x16xbf16>, vector<8x16xf32> -> vector<8x16xf32>
    %cst_46 = arith.constant dense<0.000000e+00> : vector<8x16xf32>
    %89 = tpu.matmul %13, %23, %cst_46 {dimension_numbers = #tpu.dot_dimension_numbers<[1], [0], [0], [1], [0, 0, 1, 1], [], []>} : vector<8x4xbf16>, vector<4x16xbf16>, vector<8x16xf32> -> vector<8x16xf32>
    %90 = arith.addf %88, %89 : vector<8x16xf32>
    %91 = vector.broadcast %14 : vector<8x1xf32> to vector<8x16xf32>
    %92 = arith.addf %90, %91 : vector<8x16xf32>
    %c0_47 = arith.constant 0 : index
    %c0_48 = arith.constant 0 : index
    %c0_49 = arith.constant 0 : index
    %93 = vector.load %arg7[%c0_47, %c0_48, %c0_49] : memref<2x8x16xf32, #tpu.memory_space<vmem>>, vector<1x8x16xf32>
    %94 = vector.shape_cast %93 : vector<1x8x16xf32> to vector<8x16xf32>
    %95 = vector.shape_cast %92 : vector<8x16xf32> to vector<1x8x16xf32>
    tpu.vector_store %arg7[%c0_47, %c0_48, %c0_49], %95 {strides = array<i32>} : memref<2x8x16xf32, #tpu.memory_space<vmem>>, vector<1x8x16xf32>,
    %c1_50 = arith.constant 1 : index
    %c0_51 = arith.constant 0 : index
    %c0_52 = arith.constant 0 : index
    %96 = vector.load %arg1[%c1_50, %c0_51, %c0_52] : memref<2x4x20xbf16, #tpu.memory_space<vmem>>, vector<1x4x20xbf16>
    %97 = vector.shape_cast %96 : vector<1x4x20xbf16> to vector<4x20xbf16>
    %98 = vector.extract_strided_slice %97 {offsets = [0, 2], sizes = [4, 16], strides = [1, 1]} : vector<4x20xbf16> to vector<4x16xbf16>
    %99 = vector.extract_strided_slice %97 {offsets = [0, 0], sizes = [4, 18], strides = [1, 1]} : vector<4x20xbf16> to vector<4x18xbf16>
    %cst_53 = arith.constant dense<0.000000e+00> : vector<8x18xf32>
    %100 = tpu.matmul %1, %99, %cst_53 {dimension_numbers = #tpu.dot_dimension_numbers<[1], [0], [0], [1], [0, 0, 1, 1], [], []>} : vector<8x4xbf16>, vector<4x18xbf16>, vector<8x18xf32> -> vector<8x18xf32>
    %101 = vector.extract_strided_slice %97 {offsets = [0, 1], sizes = [4, 18], strides = [1, 1]} : vector<4x20xbf16> to vector<4x18xbf16>
    %cst_54 = arith.constant dense<0.000000e+00> : vector<8x18xf32>
    %102 = tpu.matmul %3, %101, %cst_54 {dimension_numbers = #tpu.dot_dimension_numbers<[1], [0], [0], [1], [0, 0, 1, 1], [], []>} : vector<8x4xbf16>, vector<4x18xbf16>, vector<8x18xf32> -> vector<8x18xf32>
    %103 = arith.addf %100, %102 : vector<8x18xf32>
    %104 = vector.extract_strided_slice %97 {offsets = [0, 2], sizes = [4, 18], strides = [1, 1]} : vector<4x20xbf16> to vector<4x18xbf16>
    %cst_55 = arith.constant dense<0.000000e+00> : vector<8x18xf32>
    %105 = tpu.matmul %5, %104, %cst_55 {dimension_numbers = #tpu.dot_dimension_numbers<[1], [0], [0], [1], [0, 0, 1, 1], [], []>} : vector<8x4xbf16>, vector<4x18xbf16>, vector<8x18xf32> -> vector<8x18xf32>
    %106 = arith.addf %103, %105 : vector<8x18xf32>
    %cst_56 = arith.constant 0.000000e+00 : f32
    %107 = vector.broadcast %cst_56 : f32 to vector<8x18xf32>
    %108 = arith.select %20, %106, %107 : vector<8x18xi1>, vector<8x18xf32>
    %cst_57 = arith.constant dense<0.000000e+00> : vector<8xf32>
    %109 = vector.multi_reduction <add>, %108, %cst_57 [1] : vector<8x18xf32> to vector<8xf32>
    %110 = vector.shape_cast %109 : vector<8xf32> to vector<8x1xf32>
    %cst_58 = arith.constant 6.250000e-02 : f32
    %111 = vector.broadcast %cst_58 : f32 to vector<8x1xf32>
    %112 = arith.mulf %110, %111 : vector<8x1xf32>
    %113 = vector.broadcast %112 : vector<8x1xf32> to vector<8x18xf32>
    %114 = arith.subf %108, %113 : vector<8x18xf32>
    %cst_59 = arith.constant 0.000000e+00 : f32
    %115 = vector.broadcast %cst_59 : f32 to vector<8x18xf32>
    %116 = arith.select %20, %114, %115 : vector<8x18xi1>, vector<8x18xf32>
    %117 = arith.mulf %116, %116 : vector<8x18xf32>
    %cst_60 = arith.constant dense<0.000000e+00> : vector<8xf32>
    %118 = vector.multi_reduction <add>, %117, %cst_60 [1] : vector<8x18xf32> to vector<8xf32>
    %119 = vector.shape_cast %118 : vector<8xf32> to vector<8x1xf32>
    %cst_61 = arith.constant 6.250000e-02 : f32
    %120 = vector.broadcast %cst_61 : f32 to vector<8x1xf32>
    %121 = arith.mulf %119, %120 : vector<8x1xf32>
    %cst_62 = arith.constant 9.99999974E-6 : f32
    %122 = vector.broadcast %cst_62 : f32 to vector<8x1xf32>
    %123 = arith.addf %121, %122 : vector<8x1xf32>
    %124 = math.rsqrt %123 : vector<8x1xf32>
    %125 = vector.broadcast %124 : vector<8x1xf32> to vector<8x18xf32>
    %126 = arith.mulf %116, %125 : vector<8x18xf32>
    %cst_63 = arith.constant 0.000000e+00 : f32
    %127 = vector.broadcast %cst_63 : f32 to vector<8x18xf32>
    %128 = arith.cmpf oge, %126, %127 : vector<8x18xf32>
    %cst_64 = arith.constant 2.000000e-01 : f32
    %129 = vector.broadcast %cst_64 : f32 to vector<8x18xf32>
    %130 = arith.mulf %129, %126 : vector<8x18xf32>
    %131 = arith.select %128, %126, %130 : vector<8x18xi1>, vector<8x18xf32>
    %132 = arith.truncf %131 : vector<8x18xf32> to vector<8x18xbf16>
    %133 = vector.extract_strided_slice %132 {offsets = [0, 0], sizes = [8, 16], strides = [1, 1]} : vector<8x18xbf16> to vector<8x16xbf16>
    %cst_65 = arith.constant dense<0.000000e+00> : vector<8x16xf32>
    %134 = tpu.matmul %7, %133, %cst_65 {dimension_numbers = #tpu.dot_dimension_numbers<[1], [0], [0], [1], [0, 0, 1, 1], [], []>} : vector<8x8xbf16>, vector<8x16xbf16>, vector<8x16xf32> -> vector<8x16xf32>
    %135 = vector.extract_strided_slice %132 {offsets = [0, 1], sizes = [8, 16], strides = [1, 1]} : vector<8x18xbf16> to vector<8x16xbf16>
    %cst_66 = arith.constant dense<0.000000e+00> : vector<8x16xf32>
    %136 = tpu.matmul %9, %135, %cst_66 {dimension_numbers = #tpu.dot_dimension_numbers<[1], [0], [0], [1], [0, 0, 1, 1], [], []>} : vector<8x8xbf16>, vector<8x16xbf16>, vector<8x16xf32> -> vector<8x16xf32>
    %137 = arith.addf %134, %136 : vector<8x16xf32>
    %138 = vector.extract_strided_slice %132 {offsets = [0, 2], sizes = [8, 16], strides = [1, 1]} : vector<8x18xbf16> to vector<8x16xbf16>
    %cst_67 = arith.constant dense<0.000000e+00> : vector<8x16xf32>
    %139 = tpu.matmul %11, %138, %cst_67 {dimension_numbers = #tpu.dot_dimension_numbers<[1], [0], [0], [1], [0, 0, 1, 1], [], []>} : vector<8x8xbf16>, vector<8x16xbf16>, vector<8x16xf32> -> vector<8x16xf32>
    %140 = arith.addf %137, %139 : vector<8x16xf32>
    %cst_68 = arith.constant dense<0.000000e+00> : vector<8xf32>
    %141 = vector.multi_reduction <add>, %140, %cst_68 [1] : vector<8x16xf32> to vector<8xf32>
    %142 = vector.shape_cast %141 : vector<8xf32> to vector<8x1xf32>
    %cst_69 = arith.constant 1.600000e+01 : f32
    %143 = vector.broadcast %cst_69 : f32 to vector<8x1xf32>
    %144 = arith.divf %142, %143 : vector<8x1xf32>
    %145 = vector.broadcast %144 : vector<8x1xf32> to vector<8x16xf32>
    %146 = arith.subf %140, %145 : vector<8x16xf32>
    %147 = arith.mulf %146, %146 : vector<8x16xf32>
    %cst_70 = arith.constant dense<0.000000e+00> : vector<8xf32>
    %148 = vector.multi_reduction <add>, %147, %cst_70 [1] : vector<8x16xf32> to vector<8xf32>
    %149 = vector.shape_cast %148 : vector<8xf32> to vector<8x1xf32>
    %cst_71 = arith.constant 1.600000e+01 : f32
    %150 = vector.broadcast %cst_71 : f32 to vector<8x1xf32>
    %151 = arith.divf %149, %150 : vector<8x1xf32>
    %cst_72 = arith.constant 9.99999974E-6 : f32
    %152 = vector.broadcast %cst_72 : f32 to vector<8x1xf32>
    %153 = arith.addf %151, %152 : vector<8x1xf32>
    %154 = math.rsqrt %153 : vector<8x1xf32>
    %155 = vector.broadcast %154 : vector<8x1xf32> to vector<8x16xf32>
    %156 = arith.mulf %146, %155 : vector<8x16xf32>
    %cst_73 = arith.constant 0.000000e+00 : f32
    %157 = vector.broadcast %cst_73 : f32 to vector<8x16xf32>
    %158 = arith.cmpf oge, %156, %157 : vector<8x16xf32>
    %cst_74 = arith.constant 2.000000e-01 : f32
    %159 = vector.broadcast %cst_74 : f32 to vector<8x16xf32>
    %160 = arith.mulf %159, %156 : vector<8x16xf32>
    %161 = arith.select %158, %156, %160 : vector<8x16xi1>, vector<8x16xf32>
    %162 = arith.truncf %161 : vector<8x16xf32> to vector<8x16xbf16>
    %cst_75 = arith.constant dense<0.000000e+00> : vector<8x16xf32>
    %163 = tpu.matmul %12, %162, %cst_75 {dimension_numbers = #tpu.dot_dimension_numbers<[1], [0], [0], [1], [0, 0, 1, 1], [], []>} : vector<8x8xbf16>, vector<8x16xbf16>, vector<8x16xf32> -> vector<8x16xf32>
    %cst_76 = arith.constant dense<0.000000e+00> : vector<8x16xf32>
    %164 = tpu.matmul %13, %98, %cst_76 {dimension_numbers = #tpu.dot_dimension_numbers<[1], [0], [0], [1], [0, 0, 1, 1], [], []>} : vector<8x4xbf16>, vector<4x16xbf16>, vector<8x16xf32> -> vector<8x16xf32>
    %165 = arith.addf %163, %164 : vector<8x16xf32>
    %166 = vector.broadcast %14 : vector<8x1xf32> to vector<8x16xf32>
    %167 = arith.addf %165, %166 : vector<8x16xf32>
    %c1_77 = arith.constant 1 : index
    %c0_78 = arith.constant 0 : index
    %c0_79 = arith.constant 0 : index
    %168 = vector.load %arg7[%c1_77, %c0_78, %c0_79] : memref<2x8x16xf32, #tpu.memory_space<vmem>>, vector<1x8x16xf32>
    %169 = vector.shape_cast %168 : vector<1x8x16xf32> to vector<8x16xf32>
    %170 = vector.shape_cast %167 : vector<8x16xf32> to vector<1x8x16xf32>
    tpu.vector_store %arg7[%c1_77, %c0_78, %c0_79], %170 {strides = array<i32>} : memref<2x8x16xf32, #tpu.memory_space<vmem>>, vector<1x8x16xf32>,
    return
  }
  func.func @transform_0(%arg0: i32) -> (i32, i32, i32) {
    %c0_i32 = arith.constant 0 : i32
    %c0_i32_0 = arith.constant 0 : i32
    %c0_i32_1 = arith.constant 0 : i32
    return %arg0, %c0_i32, %c0_i32_0 : i32, i32, i32
  }
  func.func @transform_1(%arg0: i32) -> (i32, i32, i32) {
    %c0_i32 = arith.constant 0 : i32
    %c0_i32_0 = arith.constant 0 : i32
    %c0_i32_1 = arith.constant 0 : i32
    %c0_i32_2 = arith.constant 0 : i32
    return %c0_i32, %c0_i32_0, %c0_i32_1 : i32, i32, i32
  }
  func.func @transform_2(%arg0: i32) -> (i32, i32, i32) {
    %c0_i32 = arith.constant 0 : i32
    %c0_i32_0 = arith.constant 0 : i32
    %c0_i32_1 = arith.constant 0 : i32
    %c0_i32_2 = arith.constant 0 : i32
    return %c0_i32, %c0_i32_0, %c0_i32_1 : i32, i32, i32
  }
  func.func @transform_3(%arg0: i32) -> (i32, i32) {
    %c0_i32 = arith.constant 0 : i32
    %c0_i32_0 = arith.constant 0 : i32
    %c0_i32_1 = arith.constant 0 : i32
    return %c0_i32, %c0_i32_0 : i32, i32
  }
  func.func @transform_4(%arg0: i32) -> (i32, i32) {
    %c0_i32 = arith.constant 0 : i32
    %c0_i32_0 = arith.constant 0 : i32
    %c0_i32_1 = arith.constant 0 : i32
    return %c0_i32, %c0_i32_0 : i32, i32
  }
  func.func @transform_5(%arg0: i32) -> (i32, i32) {
    %c0_i32 = arith.constant 0 : i32
    %c0_i32_0 = arith.constant 0 : i32
    %c0_i32_1 = arith.constant 0 : i32
    return %c0_i32, %c0_i32_0 : i32, i32
  }
  func.func @transform_6(%arg0: i32) -> (i32, i32, i32) {
    %c0_i32 = arith.constant 0 : i32
    %c0_i32_0 = arith.constant 0 : i32
    %c0_i32_1 = arith.constant 0 : i32
    return %arg0, %c0_i32, %c0_i32_0 : i32, i32, i32
  }
}

</mosaic_0001>

<bundles_post_ra>
// kernel: conv1d_block_pallas.1
= control target key start
LH: loop header
LB: loop body
LE: loop exit
PB: predicated region body
PF: predicated region fallthrough
CT: control target
= control target key end

     0   :  { %s778_s0 = inlined_call_operand.vmem [shape: bf16[2,4,20], index: 0, kind: input, shape index: {}]   ;;  %s779_s1 = inlined_call_operand.vmem [shape: bf16[3,8,4], index: 1, kind: input, shape index: {}]   ;;  %s780_s2 = inlined_call_operand.vmem [shape: bf16[3,8,8], index: 2, kind: input, shape index: {}]   ;;  %s781_s3 = inlined_call_operand.vmem [shape: bf16[8,8], index: 3, kind: input, shape index: {}]   ;;  %s782_s4 = inlined_call_operand.vmem [shape: bf16[8,4], index: 4, kind: input, shape index: {}]   ;;  %s783_s5 = inlined_call_operand.vmem [shape: f32[8,1], index: 5, kind: input, shape index: {}]   ;;  %s784_s6 = inlined_call_operand.hbm [shape: f32[2,8,16], index: 6, kind: output, shape index: {}]  }
   0x1   :  { %v43_v0 = vld [vmem:[%s778_s0] sm:$0x3] }
   0x2   :  { %45 = vst [vmem:[#allocation1] ss:$4 sm:$0xff] %v43_v0 }
   0x3   :  { %11 = vsyncpa [#allocation3], 0  ;;  %s589_s23 = smov 126   ;;  %v638_v3 = vld [vmem:[%s778_s0 + $0x2] sm:$0x3]  ;;  %s590_s26 = smov 127   ;;  %v38_v16 = vlaneseq }
   0x4   :  { %vm54_vm0 = vcmask 1041408   ;;  %v648_v7 = vld [vmem:[%s779_s1] sm:$0xf]  ;;  %vm50_vm1 = vcmask 31744   ;;  %v656_v10 = vld [vmem:[%s779_s1 + $0x8] sm:$0xf] }
   0x5   :  { %v74_v6 = vsel %vm54_vm0, %v43_v0, 0  ;;  %v664_v13 = vld [vmem:[%s779_s1 + $0x4] sm:$0xf]  ;;  %v39_v17 = vand.u32 127, %v38_v16  ;;  %vm115_vm5 = vcmask 146432   ;;  %vm152_vm10 = vcmask 1043456  }
   0x6   :  { %83 = vmatpush.bf16.msra.mxu1 %v74_v6  ;;  %v685_v41 = vld [vmem:[%s782_s4] sm:$0xf]  ;;  %vm148_vm11 = vcmask 64512   ;;  %v318_v60 = vsel %vm54_vm0, %v638_v3, 0  ;;  %v711_v62 = vld [vmem:[%s780_s2 + $0x8] sm:$0xf] }
   0x7   :  { %vm40_vm2 = vcmp.ge.s32.totalorder %v39_v17, 1  ;;  %vm41_vm3 = vcmp.le.s32.totalorder %v39_v17, 16  ;;  %v693_v53 = vld [vmem:[%s780_s2] sm:$0xf]  ;;  %vm210_vm12 = vcmask 130048   ;;  %s511_s19 = sshll.u32 %s784_s6, 4  ;;  %s512_s19 = int_to_ptr.hbm [resolvable:$true] %s511_s19 }
   0x8   :  { %vm668_vm4 = vmand %vm40_vm2, %vm41_vm3  ;;  %s594_s20 = smov 128   ;;  %s595_s21 = smov 8  }
   0x9   :  { %v46_v1 = vld.sshfl [vmem:[#allocation1] sm:$0xff pattern:$0x73625140]  ;;  %528 = vmatmul.msk.bf16.vlgmr.msra.gmra.mxu1 %vm50_vm1, %v648_v7 }
   0xa   :  { %89 = vst [vmem:[#allocation1] ss:$4 sm:$0xff] %v43_v0 }
  0x11   :  { %v90_v2 = vld.sshfl [vmem:[#allocation1] sm:$0xff pattern:$0x73625140] }
  0x12   :  { %92 = vrot.lane.b32.xlu0 %v90_v2, %s589_s23  ;;  %244 = vst [vmem:[#allocation1] ss:$4 sm:$0xff] %v43_v0 }
  0x19   :  { %v245_v4 = vld.sshfl [vmem:[#allocation1] sm:$0xff pattern:$0x73625140] }
  0x1a   :  { %297 = vst [vmem:[#allocation1] ss:$4 sm:$0xff] %v638_v3  ;;  %48 = vrot.lane.b32.xlu0 %v46_v1, %s590_s26  ;;  %247 = vrot.lane.b32.xlu2 %v245_v4, %s589_s23  ;;  %v719_v1 = vld [vmem:[%s780_s2 + $0x4] sm:$0xf] }
  0x21   :  { %v298_v5 = vld.sshfl [vmem:[#allocation1] sm:$0xff pattern:$0x73625140] }
  0x22   :  { %333 = vst [vmem:[#allocation1] ss:$4 sm:$0xff] %v638_v3 }
  0x29   :  { %v334_v33 = vld.sshfl [vmem:[#allocation1] sm:$0xff pattern:$0x73625140] }
  0x2a   :  { %336 = vrot.lane.b32.xlu0 %v334_v33, %s589_s23  ;;  %465 = vst [vmem:[#allocation1] ss:$4 sm:$0xff] %v638_v3 }
  0x74   :  { %v248_v37 = vpop.permute.xlu2 %247 }
  0x75   :  { %v253_v39 = vsel %vm54_vm0, %v248_v37, 0 }
  0x84   :  { %v93_v8 = vpop.permute.xlu0 %92 }
  0x85   :  { %v98_v9 = vsel %vm54_vm0, %v93_v8, 0 }
  0x86   :  { %107 = vmatpush.bf16.msra.mxu2 %v98_v9  ;;  %v85_v14 = vpop.f32.mrf.mxu1 }
  0x89   :  { %529 = vmatmul.msk.bf16.vlgmr.msra.gmra.mxu2 %vm50_vm1, %v656_v10 }
  0x8a   :  { %262 = vmatpush.bf16.msrb.mxu2 %v253_v39 }
  0x8c   :  { %v49_v11 = vpop.permute.xlu0 %48 }
  0x8d   :  { %v56_v12 = vsel %vm54_vm0, %v49_v11, 0 }
  0x8e   :  { %65 = vmatpush.bf16.msra.mxu0 %v56_v12  ;;  %v87_v15 = vpop.f32.mrf.mxu1 }
  0x91   :  { %527 = vmatmul.msk.bf16.vlgmr.msra.gmra.mxu0 %vm50_vm1, %v664_v13 }
  0x99   :  { %533 = vmatmul.msk.bf16.vlgmr.msrb.gmra.mxu2 %vm50_vm1, %v685_v41 }
  0x9c   :  { %v337_v55 = vpop.permute.xlu0 %336 }
  0x9d   :  { %v339_v56 = vsel %vm54_vm0, %v337_v55, 0 }
  0x9e   :  { %348 = vmatpush.bf16.msra.mxu2 %v339_v56 }
  0xa9   :  { %538 = vmatmul.msk.bf16.vlgmr.msra.gmra.mxu2 %vm50_vm1, %v656_v10 }
 0x10c   :  { %v109_v18 = vpop.f32.mrf.mxu2 }
 0x10e   :  { %v67_v19 = vpop.f32.mrf.mxu0 }
 0x10f   :  { %v86_v20 = vadd.f32 %v85_v14, %v67_v19 }
 0x111   :  { %v113_v22 = vadd.f32 %v109_v18, %v86_v20 }
 0x113   :  { %v114_v23 = vsel %vm668_vm4, %v113_v22, 0.0 }
 0x114   :  { %v111_v24 = vpop.f32.mrf.mxu2  ;;  %v116_v25 = vsel %vm115_vm5, %v114_v23, 0.0 }
 0x115   :  { %117 = vadd.xlane.f32.xlu1 %v116_v25  ;;  %v591_v24 = vmov 16.0  }
 0x116   :  { %v69_v26 = vpop.f32.mrf.mxu0 }
 0x11c   :  { %v725_v2 = vpop.f32.mrf.mxu2 }
 0x124   :  { %v266_v3 = vpop.f32.mrf.mxu2 }
 0x12c   :  { %v350_v8 = vpop.f32.mrf.mxu2 }
 0x134   :  { %v352_v10 = vpop.f32.mrf.mxu2 }
 0x188   :  { %v118_v27 = vpop.xlane.xlu1 %117 }
 0x189   :  { %v119_v28 = vmul.f32 0.0625, %v118_v27 }
 0x18b   :  { %v120_v29 = vsub.f32 %v114_v23, %v119_v28 }
 0x18d   :  { %v121_v30 = vsel %vm668_vm4, %v120_v29, 0.0 }
 0x18e   :  { %v122_v31 = vmul.f32 %v121_v30, %v121_v30 }
 0x190   :  { %v123_v32 = vsel %vm115_vm5, %v122_v31, 0.0 }
 0x191   :  { %124 = vadd.xlane.f32.xlu1 %v123_v32 }
 0x1aa   :  { %300 = vrot.lane.b32.xlu1 %v298_v5, %s590_s26 }
 0x204   :  { %v125_v34 = vpop.xlane.xlu1 %124 }
 0x205   :  { %v126_v35 = vmul.f32 0.0625, %v125_v34 }
 0x207   :  { %v127_v36 = vadd.f32 1e-05, %v126_v35 }
 0x209   :  { %553 = vrsqrt.f32 %v127_v36  ;;  %vm134_vm7 = vweird.f32 %v127_v36 }
 0x20a   :  { %555 = vrcp.f32 %v591_v24 }
 0x20f   :  { %v554_v38 = vpop.eup %553 }
 0x210   :  { %v129_v40 = vmul.f32 %v554_v38, %v127_v36  ;;  %vm135_vm6 = vweird.f32 %v554_v38  ;;  %v556_v25 = vpop.eup %555 }
 0x211   :  { %vm136_vm8 = vmor %vm134_vm7, %vm135_vm6  ;;  %v215_v26 = vmul.f32 16.0, %v556_v25  ;;  %vm219_vm13 = vweird.f32 %v556_v25 }
 0x212   :  { %v130_v42 = vmul.f32 %v554_v38, %v129_v40 }
 0x213   :  { %v216_v27 = vsub.f32 1.0, %v215_v26 }
 0x214   :  { %v131_v43 = vmul.f32 0.5, %v130_v42 }
 0x215   :  { %v217_v28 = vmul.f32 %v556_v25, %v216_v27 }
 0x216   :  { %v132_v44 = vsub.f32 1.5, %v131_v43 }
 0x217   :  { %v218_v29 = vadd.f32 %v556_v25, %v217_v28 }
 0x218   :  { %v133_v45 = vmul.f32 %v554_v38, %v132_v44 }
 0x21a   :  { %v137_v46 = vsel %vm136_vm8, %v554_v38, %v133_v45 }
 0x21b   :  { %v138_v47 = vmul.f32 %v137_v46, %v121_v30  ;;  %v731_v30 = vsel %vm219_vm13, %v556_v25, %v218_v29 }
 0x21c   :  { %v301_v57 = vpop.permute.xlu1 %300 }
 0x21d   :  { %vm139_vm9 = vcmp.ge.f32.partialorder %v138_v47, 0.0  ;;  %v140_v48 = vmul.f32 0.2, %v138_v47  ;;  %v303_v58 = vsel %vm54_vm0, %v301_v57, 0 }
 0x21f   :  { %v141_v49 = vsel %vm139_vm9, %v138_v47, %v140_v48 }
 0x220   :  { %v142_v50 = vpack.c.bf16 %v141_v49, %v141_v49  ;;  %v592_v49 = vmov 0  }
 0x221   :  { %551 = vset.pattern.permute.xlu2 %v592_v49  ;;  %552 = vset.pattern.permute.xlu0 %v592_v49 }
 0x222   :  { %v173_v51 = vsel %vm152_vm10, %v142_v50, 0  ;;  %v144_v52 = vunpack.c.l.b16 %v142_v50 }
 0x223   :  { %182 = vmatpush.bf16.msrb.mxu0 %v173_v51 }
 0x224   :  { %v145_v54 = vpack.c.b16 %v144_v52, %v144_v52 }
 0x226   :  { %188 = vrot.lane.b32.xlu2 %v145_v54, %s589_s23  ;;  %531 = vmatmul.msk.bf16.vlgmr.msrb.gmra.mxu0 %vm148_vm11, %v693_v53 }
 0x227   :  { %312 = vmatpush.bf16.msra.mxu0 %v303_v58 }
 0x22e   :  { %146 = vrot.lane.b32.xlu2 %v145_v54, %s590_s26 }
 0x236   :  { %536 = vmatmul.msk.bf16.vlgmr.msra.gmra.mxu0 %vm50_vm1, %v664_v13 }
 0x280   :  { %v189_v59 = vpop.permute.xlu2 %188 }
 0x281   :  { %v194_v61 = vsel %vm152_vm10, %v189_v59, 0 }
 0x282   :  { %203 = vmatpush.bf16.msrb.mxu1 %v194_v61 }
 0x285   :  { %532 = vmatmul.msk.bf16.vlgmr.msrb.gmra.mxu1 %vm148_vm11, %v711_v62 }
 0x286   :  { %327 = vmatpush.bf16.msra.mxu1 %v318_v60 }
 0x288   :  { %v147_v63 = vpop.permute.xlu2 %146 }
 0x289   :  { %v154_v0 = vsel %vm152_vm10, %v147_v63, 0 }
 0x28a   :  { %163 = vmatpush.bf16.msra.mxu3 %v154_v0 }
 0x28d   :  { %530 = vmatmul.msk.bf16.vlgmr.msra.gmra.mxu3 %vm148_vm11, %v719_v1 }
 0x295   :  { %537 = vmatmul.msk.bf16.vlgmr.msra.gmra.mxu1 %vm50_vm1, %v648_v7 }
 0x2a3   :  { %v184_v4 = vpop.f32.mrf.mxu0 }
 0x2ab   :  { %v186_v5 = vpop.f32.mrf.mxu0 }
 0x2b3   :  { %v314_v6 = vpop.f32.mrf.mxu0 }
 0x2bb   :  { %v316_v9 = vpop.f32.mrf.mxu0 }
 0x302   :  { %v205_v11 = vpop.f32.mrf.mxu1 }
 0x30a   :  { %v207_v12 = vpop.f32.mrf.mxu1 }
 0x310   :  { %v165_v13 = vpop.f32.mrf.mxu3 }
 0x311   :  { %v185_v14 = vadd.f32 %v184_v4, %v165_v13 }
 0x312   :  { %v329_v15 = vpop.f32.mrf.mxu1 }
 0x313   :  { %v330_v16 = vadd.f32 %v329_v15, %v314_v6  ;;  %v209_v17 = vadd.f32 %v205_v11, %v185_v14  ;;  %v743_v11 = vld [vmem:[%s781_s3] sm:$0xf] }
 0x315   :  { %v354_v18 = vadd.f32 %v350_v8, %v330_v16  ;;  %v211_v7 = vsel %vm210_vm12, %v209_v17, 0.0 }
 0x316   :  { %212 = vadd.xlane.f32.xlu2 %v211_v7 }
 0x317   :  { %v355_v19 = vsel %vm668_vm4, %v354_v18, 0.0 }
 0x318   :  { %v356_v20 = vsel %vm115_vm5, %v355_v19, 0.0  ;;  %v167_v22 = vpop.f32.mrf.mxu3 }
 0x319   :  { %357 = vadd.xlane.f32.xlu0 %v356_v20 }
 0x31a   :  { %v331_v23 = vpop.f32.mrf.mxu1 }
 0x389   :  { %v213_v31 = vpop.xlane.xlu2 %212 }
 0x38a   :  { %v221_v32 = vmul.f32 %v731_v30, %v213_v31 }
 0x38c   :  { %v222_v33 = vsub.f32 %v209_v17, %v221_v32  ;;  %v358_v34 = vpop.xlane.xlu0 %357  ;;  %v37_v17 = vld [vmem:[%s783_s5] sm:$0xff]  ;;  %s593_s5 = smov [#allocation2]  }
 0x38d   :  { %v359_v35 = vmul.f32 0.0625, %v358_v34  ;;  %s509_s16 = sshll.u32 %s593_s5, 4  ;;  %s510_s16 = int_to_ptr.vmem [resolvable:$true] %s509_s16 }
 0x38e   :  { %v223_v36 = vmul.f32 %v222_v33, %v222_v33 }
 0x38f   :  { %v360_v37 = vsub.f32 %v355_v19, %v359_v35 }
 0x390   :  { %v224_v38 = vsel %vm210_vm12, %v223_v36, 0.0 }
 0x391   :  { %225 = vadd.xlane.f32.xlu2 %v224_v38  ;;  %v361_v39 = vsel %vm668_vm4, %v360_v37, 0.0 }
 0x392   :  { %v362_v40 = vmul.f32 %v361_v39, %v361_v39 }
 0x394   :  { %v363_v42 = vsel %vm115_vm5, %v362_v40, 0.0 }
 0x395   :  { %364 = vadd.xlane.f32.xlu1 %v363_v42 }
 0x404   :  { %v226_v43 = vpop.xlane.xlu2 %225 }
 0x405   :  { %v227_v44 = vmul.f32 %v226_v43, %v731_v30 }
 0x407   :  { %v228_v45 = vadd.f32 1e-05, %v227_v44 }
 0x408   :  { %v365_v46 = vpop.xlane.xlu1 %364 }
 0x409   :  { %557 = vrsqrt.f32 %v228_v45  ;;  %v366_v47 = vmul.f32 0.0625, %v365_v46  ;;  %vm235_vm15 = vweird.f32 %v228_v45 }
 0x40b   :  { %v367_v48 = vadd.f32 1e-05, %v366_v47 }
 0x40d   :  { %559 = vrsqrt.f32 %v367_v48  ;;  %vm374_vm4 = vweird.f32 %v367_v48 }
 0x40f   :  { %v558_v50 = vpop.eup %557 }
 0x410   :  { %v230_v51 = vmul.f32 %v558_v50, %v228_v45  ;;  %vm236_vm14 = vweird.f32 %v558_v50 }
 0x411   :  { %vm237_vm2 = vmor %vm235_vm15, %vm236_vm14 }
 0x412   :  { %v231_v21 = vmul.f32 %v558_v50, %v230_v51 }
 0x413   :  { %v560_v52 = vpop.eup %559 }
 0x414   :  { %v232_v54 = vmul.f32 0.5, %v231_v21  ;;  %v369_v55 = vmul.f32 %v560_v52, %v367_v48  ;;  %vm375_vm3 = vweird.f32 %v560_v52 }
 0x415   :  { %vm376_vm5 = vmor %vm374_vm4, %vm375_vm3 }
 0x416   :  { %v233_v56 = vsub.f32 1.5, %v232_v54  ;;  %v370_v57 = vmul.f32 %v560_v52, %v369_v55 }
 0x418   :  { %v234_v58 = vmul.f32 %v558_v50, %v233_v56  ;;  %v371_v59 = vmul.f32 0.5, %v370_v57 }
 0x41a   :  { %v372_v60 = vsub.f32 1.5, %v371_v59  ;;  %v238_v61 = vsel %vm237_vm2, %v558_v50, %v234_v58 }
 0x41b   :  { %v239_v63 = vmul.f32 %v238_v61, %v222_v33 }
 0x41c   :  { %v373_v0 = vmul.f32 %v560_v52, %v372_v60 }
 0x41d   :  { %vm240_vm6 = vcmp.ge.f32.partialorder %v239_v63, 0.0  ;;  %v241_v3 = vmul.f32 0.2, %v239_v63 }
 0x41e   :  { %v377_v4 = vsel %vm376_vm5, %v560_v52, %v373_v0 }
 0x41f   :  { %v378_v5 = vmul.f32 %v377_v4, %v361_v39  ;;  %v242_v6 = vsel %vm240_vm6, %v239_v63, %v241_v3 }
 0x420   :  { %v243_v8 = vpack.c.bf16 %v242_v6, %v242_v6 }
 0x421   :  { %vm379_vm7 = vcmp.ge.f32.partialorder %v378_v5, 0.0  ;;  %v380_v9 = vmul.f32 0.2, %v378_v5 }
 0x422   :  { %v272_v10 = vsel %vm152_vm10, %v243_v8, 0 }
 0x423   :  { %281 = vmatpush.bf16.msrb.mxu3 %v272_v10  ;;  %v381_v12 = vsel %vm379_vm7, %v378_v5, %v380_v9 }
 0x424   :  { %v382_v13 = vpack.c.bf16 %v381_v12, %v381_v12 }
 0x426   :  { %534 = vmatmul.msk.bf16.vlgmr.msrb.gmra.mxu3 %vm148_vm11, %v743_v11  ;;  %v405_v14 = vsel %vm152_vm10, %v382_v13, 0  ;;  %v384_v15 = vunpack.c.l.b16 %v382_v13 }
 0x427   :  { %414 = vmatpush.bf16.msrb.mxu0 %v405_v14 }
 0x428   :  { %v385_v16 = vpack.c.b16 %v384_v15, %v384_v15 }
 0x42a   :  { %420 = vrot.lane.b32.xlu2 %v385_v16, %s589_s23  ;;  %386 = vrot.lane.b32.xlu0 %v385_v16, %s590_s26 }
 0x42b   :  { %540 = vmatmul.msk.bf16.vlgmr.msrb.gmra.mxu0 %vm148_vm11, %v693_v53 }
 0x432   :  { %289 = vperm.xlu2 %551, %v37_v17  }
 0x484   :  { %v421_v18 = vpop.permute.xlu2 %420 }
 0x485   :  { %v423_v7 = vsel %vm152_vm10, %v421_v18, 0 }
 0x486   :  { %432 = vmatpush.bf16.msrb.mxu1 %v423_v7 }
 0x489   :  { %541 = vmatmul.msk.bf16.vlgmr.msrb.gmra.mxu1 %vm148_vm11, %v711_v62 }
 0x48c   :  { %v290_v23 = vpop.permute.xlu2 %289 }
 0x49c   :  { %v387_v19 = vpop.permute.xlu0 %386 }
 0x49d   :  { %v389_v20 = vsel %vm152_vm10, %v387_v19, 0 }
 0x49e   :  { %398 = vmatpush.bf16.msra.mxu3 %v389_v20 }
 0x4a1   :  { %539 = vmatmul.msk.bf16.vlgmr.msra.gmra.mxu3 %vm148_vm11, %v719_v1  ;;  %v466_v1 = vld.sshfl [vmem:[#allocation1] sm:$0xff pattern:$0x73625140] }
 0x4a8   :  { %v416_v53 = vpop.f32.mrf.mxu0 }
 0x4a9   :  { %v283_v22 = vpop.f32.mrf.mxu3 }
 0x4aa   :  { %v284_v24 = vadd.f32 %v283_v22, %v725_v2 }
 0x4ac   :  { %v292_v25 = vadd.f32 %v290_v23, %v284_v24 }
 0x4ae   :  { %293 = vst.msk [vmem:[#allocation2] sm:$0xff] %vm210_vm12, %v292_v25 }
 0x4b0   :  { %v418_v26 = vpop.f32.mrf.mxu0 }
 0x4b1   :  { %v285_v27 = vpop.f32.mrf.mxu3 }
 0x506   :  { %v434_v28 = vpop.f32.mrf.mxu1 }
 0x50e   :  { %v436_v29 = vpop.f32.mrf.mxu1 }
 0x524   :  { %v400_v62 = vpop.f32.mrf.mxu3 }
 0x525   :  { %v417_v31 = vadd.f32 %v416_v53, %v400_v62 }
 0x527   :  { %v438_v32 = vadd.f32 %v434_v28, %v417_v31 }
 0x529   :  { %v439_v33 = vsel %vm210_vm12, %v438_v32, 0.0 }
 0x52a   :  { %440 = vadd.xlane.f32.xlu1 %v439_v33 }
 0x52c   :  { %v402_v34 = vpop.f32.mrf.mxu3 }
 0x543   :  { %468 = vrot.lane.b32.xlu1 %v466_v1, %s589_s23 }
 0x59d   :  { %v441_v35 = vpop.xlane.xlu1 %440 }
 0x59e   :  { %v442_v2 = vmul.f32 %v441_v35, %v731_v30 }
 0x5a0   :  { %v443_v36 = vsub.f32 %v438_v32, %v442_v2 }
 0x5a2   :  { %v444_v37 = vmul.f32 %v443_v36, %v443_v36 }
 0x5a4   :  { %v445_v38 = vsel %vm210_vm12, %v444_v37, 0.0 }
 0x5a5   :  { %446 = vadd.xlane.f32.xlu0 %v445_v38 }
 0x5b5   :  { %v469_v39 = vpop.permute.xlu1 %468 }
 0x5b6   :  { %v471_v40 = vsel %vm54_vm0, %v469_v39, 0 }
 0x5b7   :  { %480 = vmatpush.bf16.msrb.mxu2 %v471_v40 }
 0x5ba   :  { %542 = vmatmul.msk.bf16.vlgmr.msrb.gmra.mxu2 %vm50_vm1, %v685_v41 }
 0x618   :  { %v447_v42 = vpop.xlane.xlu0 %446 }
 0x619   :  { %v448_v43 = vmul.f32 %v447_v42, %v731_v30 }
 0x61b   :  { %v449_v44 = vadd.f32 1e-05, %v448_v43 }
 0x61d   :  { %561 = vrsqrt.f32 %v449_v44  ;;  %vm456_vm9 = vweird.f32 %v449_v44 }
 0x623   :  { %v562_v45 = vpop.eup %561 }
 0x624   :  { %v451_v46 = vmul.f32 %v562_v45, %v449_v44  ;;  %vm457_vm8 = vweird.f32 %v562_v45 }
 0x625   :  { %vm458_vm13 = vmor %vm456_vm9, %vm457_vm8 }
 0x626   :  { %v452_v47 = vmul.f32 %v562_v45, %v451_v46 }
 0x628   :  { %v453_v48 = vmul.f32 0.5, %v452_v47 }
 0x62a   :  { %v454_v49 = vsub.f32 1.5, %v453_v48 }
 0x62c   :  { %v455_v50 = vmul.f32 %v562_v45, %v454_v49 }
 0x62e   :  { %v459_v51 = vsel %vm458_vm13, %v562_v45, %v455_v50 }
 0x62f   :  { %v460_v21 = vmul.f32 %v459_v51, %v443_v36 }
 0x631   :  { %vm461_vm0 = vcmp.ge.f32.partialorder %v460_v21, 0.0  ;;  %v462_v52 = vmul.f32 0.2, %v460_v21 }
 0x633   :  { %v463_v54 = vsel %vm461_vm0, %v460_v21, %v462_v52 }
 0x634   :  { %v464_v41 = vpack.c.bf16 %v463_v54, %v463_v54 }
 0x636   :  { %v487_v55 = vsel %vm152_vm10, %v464_v41, 0 }
 0x637   :  { %496 = vmatpush.bf16.msrb.mxu3 %v487_v55 }
 0x63a   :  { %543 = vmatmul.msk.bf16.vlgmr.msrb.gmra.mxu3 %vm148_vm11, %v743_v11 }
 0x63d   :  { %v482_v30 = vpop.f32.mrf.mxu2 }
 0x645   :  { %v484_v56 = vpop.f32.mrf.mxu2 }
 0x6bd   :  { %v498_v57 = vpop.f32.mrf.mxu3 }
 0x6be   :  { %v499_v58 = vadd.f32 %v498_v57, %v482_v30 }
 0x6c0   :  { %v502_v59 = vadd.f32 %v499_v58, %v290_v23 }
 0x6c2   :  { %504 = vst.msk [vmem:[#allocation2 + $0x8] sm:$0xff] %vm210_vm12, %v502_v59 }
 0x6c3   :  { %517 = dma.vmem_to_hbm [thread:$0]  %s510_s16, 256, %s512_s19, [#allocation3], %s594_s20, %s594_s20, %s595_s21  }
 0x6c5   :  { %v500_v60 = vpop.f32.mrf.mxu3 }
 0x6c6   :  { %587 = dma.done.wait [#allocation3], 256  }
 0x6c7   :  { %588 = vsyncadd [#allocation3], 4294967040 }
 0x6c8   :  { %522 = vsyncpa [#allocation3], 1 }

</bundles_post_ra>
